<compile_context>
chip_gen: v7x
topology: tpu7x:2x2x1
jax: 0.10.0
libtpu: 0.0.40
codegen_flags: <defaults>
</compile_context>

<pallas_src>
import functools

import jax
import jax.numpy as jnp
from jax.experimental import pallas as pl
from jax.experimental.pallas import tpu as pltpu


def _round_up(x, m):
    return ((x + m - 1) // m) * m


def _cdiv(a, b):
    return (a + b - 1) // b


# ---------------------------------------------------------------------------
# Hardware queries (best effort; conservative defaults if unavailable).
# ---------------------------------------------------------------------------

@functools.lru_cache(maxsize=1)
def _vmem_budget_bytes():
    """~90% of per-TensorCore VMEM; falls back to 64 MiB (v7x) if unknown."""
    cap = None
    try:
        info = pltpu.get_tpu_info()
        cap = getattr(info, "vmem_capacity_bytes", None)
    except Exception:
        cap = None
    if not cap or cap <= 0:
        cap = 64 * 1024 * 1024
    return int(cap) * 9 // 10


@functools.lru_cache(maxsize=1)
def _num_tensorcores():
    """TensorCores per JAX device (2 on v4/v5p megacore and v7x, else 1)."""
    try:
        info = pltpu.get_tpu_info()
        for attr in ("num_cores", "num_tensorcores", "tensorcore_count", "core_count"):
            v = getattr(info, attr, None)
            if isinstance(v, int) and v > 0:
                return v
    except Exception:
        pass
    try:
        kind = jax.devices()[0].device_kind.lower()
        if any(tag in kind for tag in ("v7", "7x", "v5p", "v4")):
            return 2
    except Exception:
        pass
    return 1


# ---------------------------------------------------------------------------
# VMEM accounting & plan selection.
# ---------------------------------------------------------------------------

_MARGIN = 2 << 20          # headroom for Mosaic internal scratch
_VMEM_FLOOR = 16 << 20     # never request less than this


def _resident_vmem_bytes(tm, H, O_pad, x_bytes, w_bytes, weight_bufs):
    act = (2 * tm * H * x_bytes            # x row tile (double-buffered)
           + 2 * tm * O_pad * x_bytes      # out tile (double-buffered)
           + 2 * tm * H * 4                # f32 h1 / h2
           + 2 * tm * H * w_bytes          # w-dtype re-casts of h1 / h2
           + tm * O_pad * 4)               # f32 out before final cast
    wts = weight_bufs * (2 * H * H + H * O_pad + 2 * H + O_pad) * w_bytes
    return act + wts


def _stream_vmem_bytes(tm, H, th, O_pad, x_bytes, w_bytes, weight_bufs):
    act = (2 * tm * H * x_bytes            # x row tile
           + 2 * tm * O_pad * x_bytes      # out tile
           + tm * H * 4                    # f32 layer-2 accumulator (scratch)
           + tm * th * (4 + w_bytes)       # h1 column block (f32 + re-cast)
           + tm * H * w_bytes              # h2 re-cast
           + tm * O_pad * 4)               # f32 out before final cast
    wts = (2 * (H * th + th + th * H) * w_bytes                 # streamed W1/b1/W2 tiles
           + weight_bufs * (H + H * O_pad + O_pad) * w_bytes)   # resident b2/W3/b3
    return act + wts


def _plan(M, H, O, x_bytes, w_bytes, tm_req, force_stream, stream_tile):
    """Pick (tm, th, O_pad, stream, vmem_limit) for the given problem."""
    O_pad = _round_up(max(O, 128), 128)        # lane-dense output stores
    budget = _vmem_budget_bytes()
    pack = max(8, 8 * (4 // max(1, x_bytes)))  # sublane packing: 8 f32 / 16 bf16 / 32 i8
    tm_cap = _round_up(M, pack)

    can_stream = (H % 128 == 0)
    stream = bool(force_stream) and can_stream
    if not stream and can_stream:
        # Stream W1/W2 once even the smallest row tile can't keep them resident.
        if _resident_vmem_bytes(pack, H, O_pad, x_bytes, w_bytes, 1) + _MARGIN > budget:
            stream = True

    if tm_req is not None:
        tm_candidates = [_round_up(int(tm_req), pack)]
    else:
        tm_candidates = [t for t in (512, 256, 128, 64, 32, 16, 8) if t % pack == 0]

    tm = None
    th = None
    for cand in tm_candidates:
        cand = min(cand, tm_cap)
        if stream:
            ths = [stream_tile] if stream_tile else [512, 384, 256, 128]
            for t in ths:
                if t is None or H % t or t % 128:
                    continue
                if (_stream_vmem_bytes(cand, H, t, O_pad, x_bytes, w_bytes, 1)
                        + _MARGIN <= budget):
                    tm, th = cand, t
                    break
        else:
            if _resident_vmem_bytes(cand, H, O_pad, x_bytes, w_bytes, 1) + _MARGIN <= budget:
                tm = cand
        if tm is not None:
            break
    if tm is None:
        # Nothing fit the budget; use the smallest configuration and hope.
        tm = min(pack, tm_cap)
        th = 128 if stream else None

    # Keep the row grid >= 2 only on chips whose 2 TensorCores can shard it.
    if _num_tensorcores() >= 2 and _cdiv(M, tm) < 2 and tm > pack:
        tm = max(pack, _round_up(_cdiv(tm, 2), pack))

    if stream:
        need = _stream_vmem_bytes(tm, H, th, O_pad, x_bytes, w_bytes, 1)
    else:
        need = _resident_vmem_bytes(tm, H, O_pad, x_bytes, w_bytes, 1)
    vmem_limit = int(min(budget, max(_VMEM_FLOOR, need + _MARGIN)))
    return tm, th, O_pad, stream, vmem_limit


# ---------------------------------------------------------------------------
# Kernels.
# ---------------------------------------------------------------------------

def _nn_head_kernel(x_ref, w1_ref, b1_ref, w2_ref, b2_ref, w3_ref, b3_ref, o_ref):
    """Fused relu(relu(x@W1+b1)@W2+b2)@W3+b3 for one row tile (weights resident)."""
    f32 = jnp.float32
    x = x_ref[...]  # stored dtype -> native bf16 MXU path when params/acts are bf16

    h1 = jnp.dot(x, w1_ref[...], preferred_element_type=f32)
    h1 = jnp.maximum(h1 + b1_ref[...].astype(f32), 0.0)

    h2 = jnp.dot(h1.astype(w2_ref.dtype), w2_ref[...], preferred_element_type=f32)
    h2 = jnp.maximum(h2 + b2_ref[...].astype(f32), 0.0)

    out = jnp.dot(h2.astype(w3_ref.dtype), w3_ref[...], preferred_element_type=f32)
    o_ref[...] = (out + b3_ref[...].astype(f32)).astype(o_ref.dtype)


def _nn_head_stream_kernel(x_ref, w1_ref, b1_ref, w2_ref, b2_ref, w3_ref, b3_ref,
                           o_ref, acc_ref):
    """Same math, but W1 column tiles / W2 row tiles stream over grid axis 1.

    For hidden tile j:  acc += relu(x @ W1[:, j] + b1[j]) @ W2[j, :]
    At the last j:      out = relu(acc + b2) @ W3 + b3
    Only O(tm*H) activations and O(H*th) weight tiles are resident in VMEM.
    """
    j = pl.program_id(1)
    f32 = jnp.float32

    @pl.when(j == 0)
    def _():
        acc_ref[...] = jnp.zeros_like(acc_ref)

    h1 = jnp.dot(x_ref[...], w1_ref[...], preferred_element_type=f32)
    h1 = jnp.maximum(h1 + b1_ref[...].astype(f32), 0.0)
    acc_ref[...] += jnp.dot(h1.astype(w2_ref.dtype), w2_ref[...],
                            preferred_element_type=f32)

    @pl.when(j == pl.num_programs(1) - 1)
    def _():
        h2 = jnp.maximum(acc_ref[...] + b2_ref[...].astype(f32), 0.0)
        out = jnp.dot(h2.astype(w3_ref.dtype), w3_ref[...], preferred_element_type=f32)
        o_ref[...] = (out + b3_ref[...].astype(f32)).astype(o_ref.dtype)


# ---------------------------------------------------------------------------
# pallas_call builders.
# ---------------------------------------------------------------------------

@functools.lru_cache(maxsize=None)
def _build_forward_2d(M, H, O, O_pad, tm, th, stream, x_dtype_name, w_dtype_name,
                      single_buffer_weights, vmem_limit):
    """Returns a jitted fn (x2d, w1, b1, w2, b2, w3, b3) -> (M, O[_pad->sliced]) output."""
    x_dtype = jnp.dtype(x_dtype_name)
    w_dtype = jnp.dtype(w_dtype_name)
    grid_rank = 2 if stream else 1

    def invariant_spec(shape):
        # Grid-invariant blocks: a second pipeline buffer is pure VMEM waste.
        zeros = (0,) * len(shape)
        if grid_rank == 1:
            index_map = lambda i, _z=zeros: _z
        else:
            index_map = lambda i, j, _z=zeros: _z
        if single_buffer_weights:
            return pl.BlockSpec(shape, index_map, pipeline_mode=pl.Buffered(1))
        return pl.BlockSpec(shape, index_map)

    flops = 2 * M * (H * H + H * H + H * O_pad)
    bytes_accessed = (M * H * x_dtype.itemsize
                      + (2 * H * H + H * O_pad + 2 * H + O_pad) * w_dtype.itemsize
                      + M * O_pad * x_dtype.itemsize)
    cost = pl.CostEstimate(flops=flops, transcendentals=0,
                           bytes_accessed=bytes_accessed)
    out_shape = jax.ShapeDtypeStruct((M, O_pad), x_dtype)

    if not stream:
        call = pl.pallas_call(
            _nn_head_kernel,
            out_shape=out_shape,
            grid_spec=pltpu.PrefetchScalarGridSpec(
                num_scalar_prefetch=0,
                grid=(_cdiv(M, tm),),
                in_specs=[
                    pl.BlockSpec((tm, H), lambda i: (i, 0)),   # x row tile
                    invariant_spec((H, H)),                    # W1
                    invariant_spec((1, H)),                    # b1
                    invariant_spec((H, H)),                    # W2
                    invariant_spec((1, H)),                    # b2
                    invariant_spec((H, O_pad)),                # W3 (lane padded)
                    invariant_spec((1, O_pad)),                # b3 (lane padded)
                ],
                out_specs=pl.BlockSpec((tm, O_pad), lambda i: (i, 0)),
            ),
            compiler_params=pltpu.CompilerParams(
                dimension_semantics=("parallel",),
                vmem_limit_bytes=vmem_limit,
            ),
            cost_estimate=cost,
        )
    else:
        call = pl.pallas_call(
            _nn_head_stream_kernel,
            out_shape=out_shape,
            grid_spec=pltpu.PrefetchScalarGridSpec(
                num_scalar_prefetch=0,
                grid=(_cdiv(M, tm), H // th),
                in_specs=[
                    pl.BlockSpec((tm, H), lambda i, j: (i, 0)),   # x row tile
                    pl.BlockSpec((H, th), lambda i, j: (0, j)),   # W1 column tile (streamed)
                    pl.BlockSpec((1, th), lambda i, j: (0, j)),   # b1 tile
                    pl.BlockSpec((th, H), lambda i, j: (j, 0)),   # W2 row tile (streamed)
                    invariant_spec((1, H)),                       # b2
                    invariant_spec((H, O_pad)),                   # W3 (lane padded)
                    invariant_spec((1, O_pad)),                   # b3 (lane padded)
                ],
                out_specs=pl.BlockSpec((tm, O_pad), lambda i, j: (i, 0)),
                scratch_shapes=[pltpu.VMEM((tm, H), jnp.float32)],
            ),
            compiler_params=pltpu.CompilerParams(
                dimension_semantics=("parallel", "arbitrary"),
                vmem_limit_bytes=vmem_limit,
            ),
            cost_estimate=cost,
        )

    def fwd(x2d, w1, b1, w2, b2, w3, b3):
        # Only W3/b3 (tiny) get lane-padded; activations are NOT padded on host.
        if O_pad != O:
            w3 = jnp.pad(w3, ((0, 0), (0, O_pad - O)))
            b3 = jnp.pad(b3, ((0, 0), (0, O_pad - O)))
        out = call(x2d, w1, b1, w2, b2, w3, b3)
        if O_pad != O:
            out = out[:, :O]
        return out

    return jax.jit(fwd)


# ---------------------------------------------------------------------------
# Public forward.
# ---------------------------------------------------------------------------

_single_buffer_ok = {}
_FALLBACK_ERRORS = tuple(
    e for e in (TypeError, ValueError, NotImplementedError,
                getattr(pltpu, "LoweringException", None),
                getattr(getattr(jax, "errors", None), "JaxRuntimeError", None))
    if isinstance(e, type) and issubclass(e, BaseException))


def nn_head_forward(hidden_states, params, *, tm=None, force_stream=False,
                    stream_tile=None):
    """hidden_states: (B, S, H). params from init_nn_head_params. Returns (B, S, O)."""
    w1, b1, w2, b2, w3, b3 = params
    B, S, H = hidden_states.shape
    O = w3.shape[1]
    M = B * S

    x_dt = jnp.dtype(hidden_states.dtype)
    w_dt = jnp.dtype(w1.dtype)
    tm_eff, th, O_pad, stream, vmem_limit = _plan(
        M, H, O, x_dt.itemsize, w_dt.itemsize, tm, force_stream, stream_tile)

    x2d = hidden_states.reshape(M, H)
    args = (x2d, w1, b1, w2, b2, w3, b3)
    build_key = (M, H, O, O_pad, tm_eff, th, stream, str(x_dt), str(w_dt))

    # TODO(synk): in serving loops with highly variable B*S, bucket M to a few
    # tile multiples before this point to avoid one Mosaic compile per token count.

    out2d = None
    if _single_buffer_ok.get(build_key, True):
        try:
            out2d = _build_forward_2d(*build_key, True, vmem_limit)(*args)
            _single_buffer_ok[build_key] = True
        except _FALLBACK_ERRORS:
            # This JAX build / config rejected Buffered(1); fall back per-config.
            _single_buffer_ok[build_key] = False
    if out2d is None:
        out2d = _build_forward_2d(*build_key, False, vmem_limit)(*args)

    return out2d.reshape(B, S, O)


# ---------------------------------------------------------------------------
# Params + reference.
# ---------------------------------------------------------------------------

def init_nn_head_params(key, hidden_size, output_size, dtype=jnp.float32,
                        xavier_init=True, additional_sd_divider=1.0):
    """Deterministic synthetic init matching NNHead.__init__ shapes.
    Weights stored transposed relative to PyTorch: (in_features, out_features).
    Tip: pass dtype=jnp.bfloat16 for production — halves resident-weight VMEM
    and hits the native bf16 MXU path (f32 accumulation is kept in-kernel)."""
    k1, k2, k3 = jax.random.split(key, 3)

    def xavier(k, fan_in, fan_out):
        limit = jnp.sqrt(6.0 / (fan_in + fan_out))
        w = jax.random.uniform(k, (fan_in, fan_out), dtype=jnp.float32,
                               minval=-limit, maxval=limit)
        if xavier_init:
            w = w / additional_sd_divider
        return w.astype(dtype)

    w1 = xavier(k1, hidden_size, hidden_size)
    b1 = jnp.zeros((1, hidden_size), dtype=dtype)
    w2 = xavier(k2, hidden_size, hidden_size)
    b2 = jnp.zeros((1, hidden_size), dtype=dtype)
    w3 = xavier(k3, hidden_size, output_size)
    b3 = jnp.zeros((1, output_size), dtype=dtype)
    return (w1, b1, w2, b2, w3, b3)


def nn_head_ref(hidden_states, params):
    """Pure-JAX reference with the same mixed-precision contract as the kernel."""
    w1, b1, w2, b2, w3, b3 = params
    B, S, H = hidden_states.shape
    x = hidden_states.reshape(B * S, H)
    f32 = jnp.float32
    h1 = jnp.maximum(jnp.dot(x, w1, preferred_element_type=f32) + b1.astype(f32), 0.0)
    h2 = jnp.maximum(jnp.dot(h1.astype(w2.dtype), w2, preferred_element_type=f32)
                     + b2.astype(f32), 0.0)
    out = jnp.dot(h2.astype(w3.dtype), w3, preferred_element_type=f32) + b3.astype(f32)
    return out.astype(hidden_states.dtype).reshape(B, S, w3.shape[1])


if __name__ == "__main__":
    batch, seq, hidden, output = 2, 8, 32, 8

    key = jax.random.PRNGKey(0)
    k_x, k_x2, k_x3, k_p, k_p2 = jax.random.split(key, 5)

    # --- f32, small H: resident-weight path ----------------------------------
    hidden_states = jax.random.normal(k_x, (batch, seq, hidden), dtype=jnp.float32)
    params = init_nn_head_params(k_p, hidden, output, dtype=jnp.float32,
                                 xavier_init=True, additional_sd_divider=1.0)
    out = jax.block_until_ready(nn_head_forward(hidden_states, params))
    ref = nn_head_ref(hidden_states, params)
    assert out.shape == (batch, seq, output), out.shape
    assert jnp.allclose(out, ref, atol=1e-4, rtol=1e-4), "mismatch vs reference"

    # --- ragged token count (M=15): partial trailing row tile, no host pad ---
    hs2 = jax.random.normal(k_x2, (3, 5, hidden), dtype=jnp.float32)
    out2 = jax.block_until_ready(nn_head_forward(hs2, params))
    ref2 = nn_head_ref(hs2, params)
    assert out2.shape == (3, 5, output), out2.shape
    assert jnp.allclose(out2, ref2, atol=1e-4, rtol=1e-4), "mismatch (ragged)"

    # --- bf16 activations + weights: native MXU dtype path -------------------
    hs_bf = hidden_states.astype(jnp.bfloat16)
    params_bf = jax.tree_util.tree_map(lambda p: p.astype(jnp.bfloat16), params)
    out_bf = jax.block_until_ready(nn_head_forward(hs_bf, params_bf))
    ref_bf = nn_head_ref(hs_bf, params_bf)
    assert out_bf.shape == (batch, seq, output), out_bf.shape
    assert jnp.allclose(out_bf.astype(jnp.float32), ref_bf.astype(jnp.float32),
                        atol=5e-2, rtol=5e-2), "mismatch (bf16)"

    # --- forced hidden-dim streaming (path used when W1/W2 exceed VMEM) ------
    hidden_big = 256
    hs3 = jax.random.normal(k_x3, (2, 16, hidden_big), dtype=jnp.float32)
    params_big = init_nn_head_params(k_p2, hidden_big, output, dtype=jnp.float32,
                                     xavier_init=True, additional_sd_divider=1.0)
    out3 = jax.block_until_ready(
        nn_head_forward(hs3, params_big, force_stream=True, stream_tile=128))
    ref3 = nn_head_ref(hs3, params_big)
    assert out3.shape == (2, 16, output), out3.shape
    # Looser tolerance: K-dim chunking differs from the single-dot reference.
    assert jnp.allclose(out3, ref3, atol=1e-2, rtol=1e-2), "mismatch (streamed)"

    print("KERNEL_OK")
</pallas_src>

<mosaic_0001>
module attributes {stable_mosaic.version = 11 : i64} {
  func.func @_nn_head_kernel(%arg0: i32, %arg1: memref<16x32xf32, #tpu.memory_space<vmem>>, %arg2: memref<32x32xf32, #tpu.memory_space<vmem>>, %arg3: memref<1x32xf32, #tpu.memory_space<vmem>>, %arg4: memref<32x32xf32, #tpu.memory_space<vmem>>, %arg5: memref<1x32xf32, #tpu.memory_space<vmem>>, %arg6: memref<32x128xf32, #tpu.memory_space<vmem>>, %arg7: memref<1x128xf32, #tpu.memory_space<vmem>>, %arg8: memref<16x128xf32, #tpu.memory_space<vmem>>) attributes {dimension_semantics = [#tpu.dimension_semantics<parallel>], iteration_bounds = array<i64: 1>, scalar_prefetch = 0 : i64, scratch_operands = 0 : i64, tpu.core_type = #tpu.core_type<tc>, window_params = [{transform_indices = @transform_0, window_bounds = array<i64: 16, 32>}, {pipeline_mode = #tpu.pipeline_mode<synchronous>, transform_indices = @transform_1, window_bounds = array<i64: 32, 32>}, {pipeline_mode = #tpu.pipeline_mode<synchronous>, transform_indices = @transform_2, window_bounds = array<i64: 1, 32>}, {pipeline_mode = #tpu.pipeline_mode<synchronous>, transform_indices = @transform_3, window_bounds = array<i64: 32, 32>}, {pipeline_mode = #tpu.pipeline_mode<synchronous>, transform_indices = @transform_4, window_bounds = array<i64: 1, 32>}, {pipeline_mode = #tpu.pipeline_mode<synchronous>, transform_indices = @transform_5, window_bounds = array<i64: 32, 128>}, {pipeline_mode = #tpu.pipeline_mode<synchronous>, transform_indices = @transform_6, window_bounds = array<i64: 1, 128>}, {transform_indices = @transform_7, window_bounds = array<i64: 16, 128>}]} {
    %c0 = arith.constant 0 : index
    %c0_0 = arith.constant 0 : index
    %0 = vector.load %arg1[%c0, %c0_0] : memref<16x32xf32, #tpu.memory_space<vmem>>, vector<16x32xf32>
    %c0_1 = arith.constant 0 : index
    %c0_2 = arith.constant 0 : index
    %1 = vector.load %arg2[%c0_1, %c0_2] : memref<32x32xf32, #tpu.memory_space<vmem>>, vector<32x32xf32>
    %cst = arith.constant dense<0.000000e+00> : vector<16x32xf32>
    %2 = tpu.matmul %0, %1, %cst {dimension_numbers = #tpu.dot_dimension_numbers<[1], [0], [0], [1], [0, 0, 1, 1], [], []>} : vector<16x32xf32>, vector<32x32xf32>, vector<16x32xf32> -> vector<16x32xf32>
    %c0_3 = arith.constant 0 : index
    %c0_4 = arith.constant 0 : index
    %3 = vector.load %arg3[%c0_3, %c0_4] : memref<1x32xf32, #tpu.memory_space<vmem>>, vector<1x32xf32>
    %4 = vector.broadcast %3 : vector<1x32xf32> to vector<16x32xf32>
    %5 = arith.addf %2, %4 : vector<16x32xf32>
    %cst_5 = arith.constant 0.000000e+00 : f32
    %6 = vector.broadcast %cst_5 : f32 to vector<16x32xf32>
    %7 = arith.maximumf %5, %6 : vector<16x32xf32>
    %c0_6 = arith.constant 0 : index
    %c0_7 = arith.constant 0 : index
    %8 = vector.load %arg4[%c0_6, %c0_7] : memref<32x32xf32, #tpu.memory_space<vmem>>, vector<32x32xf32>
    %cst_8 = arith.constant dense<0.000000e+00> : vector<16x32xf32>
    %9 = tpu.matmul %7, %8, %cst_8 {dimension_numbers = #tpu.dot_dimension_numbers<[1], [0], [0], [1], [0, 0, 1, 1], [], []>} : vector<16x32xf32>, vector<32x32xf32>, vector<16x32xf32> -> vector<16x32xf32>
    %c0_9 = arith.constant 0 : index
    %c0_10 = arith.constant 0 : index
    %10 = vector.load %arg5[%c0_9, %c0_10] : memref<1x32xf32, #tpu.memory_space<vmem>>, vector<1x32xf32>
    %11 = vector.broadcast %10 : vector<1x32xf32> to vector<16x32xf32>
    %12 = arith.addf %9, %11 : vector<16x32xf32>
    %cst_11 = arith.constant 0.000000e+00 : f32
    %13 = vector.broadcast %cst_11 : f32 to vector<16x32xf32>
    %14 = arith.maximumf %12, %13 : vector<16x32xf32>
    %c0_12 = arith.constant 0 : index
    %c0_13 = arith.constant 0 : index
    %15 = vector.load %arg6[%c0_12, %c0_13] : memref<32x128xf32, #tpu.memory_space<vmem>>, vector<32x128xf32>
    %cst_14 = arith.constant dense<0.000000e+00> : vector<16x128xf32>
    %16 = tpu.matmul %14, %15, %cst_14 {dimension_numbers = #tpu.dot_dimension_numbers<[1], [0], [0], [1], [0, 0, 1, 1], [], []>} : vector<16x32xf32>, vector<32x128xf32>, vector<16x128xf32> -> vector<16x128xf32>
    %c0_15 = arith.constant 0 : index
    %c0_16 = arith.constant 0 : index
    %17 = vector.load %arg7[%c0_15, %c0_16] : memref<1x128xf32, #tpu.memory_space<vmem>>, vector<1x128xf32>
    %18 = vector.broadcast %17 : vector<1x128xf32> to vector<16x128xf32>
    %19 = arith.addf %16, %18 : vector<16x128xf32>
    %c0_17 = arith.constant 0 : index
    %c0_18 = arith.constant 0 : index
    %20 = vector.load %arg8[%c0_17, %c0_18] : memref<16x128xf32, #tpu.memory_space<vmem>>, vector<16x128xf32>
    tpu.vector_store %arg8[%c0_17, %c0_18], %19 {strides = array<i32>} : memref<16x128xf32, #tpu.memory_space<vmem>>, vector<16x128xf32>,
    return
  }
  func.func @transform_0(%arg0: i32) -> (i32, i32) {
    %c0_i32 = arith.constant 0 : i32
    %c0_i32_0 = arith.constant 0 : i32
    return %arg0, %c0_i32 : i32, i32
  }
  func.func @transform_1(%arg0: i32) -> (i32, i32) {
    %c0_i32 = arith.constant 0 : i32
    %c0_i32_0 = arith.constant 0 : i32
    %c0_i32_1 = arith.constant 0 : i32
    return %c0_i32, %c0_i32_0 : i32, i32
  }
  func.func @transform_2(%arg0: i32) -> (i32, i32) {
    %c0_i32 = arith.constant 0 : i32
    %c0_i32_0 = arith.constant 0 : i32
    %c0_i32_1 = arith.constant 0 : i32
    return %c0_i32, %c0_i32_0 : i32, i32
  }
  func.func @transform_3(%arg0: i32) -> (i32, i32) {
    %c0_i32 = arith.constant 0 : i32
    %c0_i32_0 = arith.constant 0 : i32
    %c0_i32_1 = arith.constant 0 : i32
    return %c0_i32, %c0_i32_0 : i32, i32
  }
  func.func @transform_4(%arg0: i32) -> (i32, i32) {
    %c0_i32 = arith.constant 0 : i32
    %c0_i32_0 = arith.constant 0 : i32
    %c0_i32_1 = arith.constant 0 : i32
    return %c0_i32, %c0_i32_0 : i32, i32
  }
  func.func @transform_5(%arg0: i32) -> (i32, i32) {
    %c0_i32 = arith.constant 0 : i32
    %c0_i32_0 = arith.constant 0 : i32
    %c0_i32_1 = arith.constant 0 : i32
    return %c0_i32, %c0_i32_0 : i32, i32
  }
  func.func @transform_6(%arg0: i32) -> (i32, i32) {
    %c0_i32 = arith.constant 0 : i32
    %c0_i32_0 = arith.constant 0 : i32
    %c0_i32_1 = arith.constant 0 : i32
    return %c0_i32, %c0_i32_0 : i32, i32
  }
  func.func @transform_7(%arg0: i32) -> (i32, i32) {
    %c0_i32 = arith.constant 0 : i32
    %c0_i32_0 = arith.constant 0 : i32
    return %arg0, %c0_i32 : i32, i32
  }
}

</mosaic_0001>

<bundles_post_ra>
// kernel: fwd.1
= control target key start
LH: loop header
LB: loop body
LE: loop exit
PB: predicated region body
PF: predicated region fallthrough
CT: control target
= control target key end

     0   :  { %vm39_vm0 = vcmask 261120   ;;  %s502_s1 = inlined_call_operand.vmem [shape: f32[32,32], index: 1, kind: input, shape index: {}]   ;;  %s503_s0 = inlined_call_operand.vmem [shape: f32[16,32], index: 0, kind: input, shape index: {}]   ;;  %s504_s3 = inlined_call_operand.vmem [shape: f32[32,32], index: 3, kind: input, shape index: {}]   ;;  %s505_s5 = inlined_call_operand.vmem [shape: f32[32,128], index: 5, kind: input, shape index: {}]   ;;  %s506_s2 = inlined_call_operand.vmem [shape: f32[1,32], index: 2, kind: input, shape index: {}]   ;;  %s507_s4 = inlined_call_operand.vmem [shape: f32[1,32], index: 4, kind: input, shape index: {}]   ;;  %s508_s6 = inlined_call_operand.vmem [shape: f32[1,128], index: 6, kind: input, shape index: {}]   ;;  %s509_s7 = inlined_call_operand.vmem [shape: f32[16,128], index: 7, kind: output, shape index: {}]  }
   0x1   :  { %v28_v0 = vld [vmem:[%s502_s1] sm:$0xff]  ;;  %v29_v1 = vld [vmem:[%s502_s1 + $0x8] sm:$0xff]  ;;  %v30_v2 = vld [vmem:[%s502_s1 + $0x10] sm:$0xff] }
   0x2   :  { %v375_v3 = vpack.c.bf16 %v29_v1, %v28_v0  ;;  %v31_v4 = vld [vmem:[%s502_s1 + $0x18] sm:$0xff]  ;;  %v26_v5 = vld [vmem:[%s503_s0] sm:$0xff]  ;;  %v124_v8 = vld [vmem:[%s504_s3 + $0x8] sm:$0xff] }
   0x3   :  { %v379_v6 = vpack.c.bf16 %v31_v4, %v30_v2  ;;  %350 = vmatprep.mubr.msk.f32.mxu0 %vm39_vm0, %v26_v5  ;;  %v123_v7 = vld [vmem:[%s504_s3] sm:$0xff]  ;;  %v27_v10 = vld [vmem:[%s503_s0 + $0x8] sm:$0xff]  ;;  %v125_v11 = vld [vmem:[%s504_s3 + $0x10] sm:$0xff] }
   0x4   :  { %376 = vmatprep.subr.bf16.mxu0 %v375_v3  ;;  %v383_v9 = vpack.c.bf16 %v124_v8, %v123_v7  ;;  %v126_v12 = vld [vmem:[%s504_s3 + $0x18] sm:$0xff]  ;;  %v217_v14 = vld [vmem:[%s505_s5] sm:$0xff]  ;;  %v218_v15 = vld [vmem:[%s505_s5 + $0x8] sm:$0xff] }
   0x5   :  { %378 = vmatpush3.bf16.msra.mxu0 %v375_v3  ;;  %v387_v13 = vpack.c.bf16 %v126_v12, %v125_v11  ;;  %v391_v16 = vpack.c.bf16 %v218_v15, %v217_v14  ;;  %v315_v17 = vld [vmem:[%s506_s2] ss:$0 sm:$0xff]  ;;  %v219_v24 = vld [vmem:[%s505_s5 + $0x10] sm:$0xff]  ;;  %v220_v25 = vld [vmem:[%s505_s5 + $0x18] sm:$0xff] }
   0x6   :  { %380 = vmatprep.subr.bf16.mxu0 %v379_v6  ;;  %384 = vmatprep.subr.bf16.mxu1 %v383_v9  ;;  %v395_v26 = vpack.c.bf16 %v220_v25, %v219_v24  ;;  %v318_v27 = vld [vmem:[%s507_s4] ss:$0 sm:$0xff] }
   0x7   :  { %386 = vmatpush3.bf16.msra.mxu1 %v383_v9  ;;  %v321_v34 = vld [vmem:[%s508_s6] ss:$0 sm:$0xff] }
   0x8   :  { %388 = vmatprep.subr.bf16.mxu1 %v387_v13 }
   0x9   :  { %382 = vmatpush3.bf16.msra.mxu0 %v379_v6 }
   0xa   :  { %392 = vmatprep.subr.bf16.mxu0 %v391_v16 }
   0xb   :  { %390 = vmatpush3.bf16.msra.mxu1 %v387_v13 }
   0xc   :  { %351 = vmatmul.mubr.msk.f32.vlgmr.msra.gmra.mrb[0].mxu0 %vm39_vm0, %v27_v10 }
   0xd   :  { %394 = vmatpush3.bf16.msra.mxu0 %v391_v16 }
   0xe   :  { %396 = vmatprep.subr.bf16.mxu0 %v395_v26 }
  0x11   :  { %398 = vmatpush3.bf16.msra.mxu0 %v395_v26 }
  0xdf   :  { %v352_v18 = vpop.f32.mrb[0].mxu0 }
  0xe0   :  { %v118_v19 = vadd.f32 %v352_v18, %v315_v17  ;;  %v112_v20 = vpop.f32.mrb[1].mxu0 }
  0xe1   :  { %v113_v21 = vadd.f32 %v315_v17, %v112_v20 }
  0xe2   :  { %v122_v23 = vmax.f32 %v118_v19, 0.0 }
  0xe3   :  { %v121_v22 = vmax.f32 %v113_v21, 0.0 }
  0xe5   :  { %361 = vmatprep.mubr.msk.f32.mxu1 %vm39_vm0, %v121_v22 }
  0xe6   :  { %362 = vmatmul.mubr.msk.f32.vlgmr.msra.gmra.mrb[0].mxu1 %vm39_vm0, %v122_v23 }
 0x1b9   :  { %v363_v28 = vpop.f32.mrb[0].mxu1 }
 0x1ba   :  { %v212_v29 = vadd.f32 %v363_v28, %v318_v27  ;;  %v206_v30 = vpop.f32.mrb[1].mxu1 }
 0x1bb   :  { %v207_v31 = vadd.f32 %v318_v27, %v206_v30 }
 0x1bc   :  { %v216_v33 = vmax.f32 %v212_v29, 0.0 }
 0x1bd   :  { %v215_v32 = vmax.f32 %v207_v31, 0.0 }
 0x1bf   :  { %372 = vmatprep.mubr.msk.f32.mxu0 %vm39_vm0, %v215_v32 }
 0x1c0   :  { %373 = vmatmul.mubr.msk.f32.vlgmr.msra.gmra.mrb[2].mxu0 %vm39_vm0, %v216_v33 }
 0x293   :  { %v374_v35 = vpop.f32.mrb[2].mxu0 }
 0x294   :  { %v306_v36 = vadd.f32 %v374_v35, %v321_v34  ;;  %v300_v37 = vpop.f32.mrb[3].mxu0 }
 0x295   :  { %v301_v38 = vadd.f32 %v321_v34, %v300_v37 }
 0x296   :  { %310 = vst [vmem:[%s509_s7 + $0x8] sm:$0xff] %v306_v36 }
 0x297   :  { %309 = vst [vmem:[%s509_s7] sm:$0xff] %v301_v38 }

</bundles_post_ra>
